<compile_context>
chip_gen: v7x
topology: tpu7x:2x2x1
jax: 0.10.0
libtpu: 0.0.40
codegen_flags: <defaults>
</compile_context>

<pallas_src>
import functools

import jax
import jax.numpy as jnp
from jax.experimental import pallas as pl
from jax.experimental.pallas import tpu as pltpu


_SUBLANE = 8


def _round_up(a, b):
    return (a + b - 1) // b * b


def _cdiv(a, b):
    return (a + b - 1) // b


def _vmem_capacity_bytes():
    """Physical VMEM of the current TPU; conservative 64 MiB (v7x) fallback."""
    try:
        return int(pltpu.get_tpu_info().vmem_capacity_bytes)
    except Exception:
        return 64 << 20


def _pick_tm(B, tm_max):
    """Batch-tile size: large tiles (HBM roofline), >= 4 grid steps when the
    batch allows it (v7x: 2 TensorCores x double buffering), small padding."""
    if B <= 64:
        return _round_up(B, _SUBLANE)
    n_tiles = max(4, _cdiv(B, tm_max))
    return _round_up(_cdiv(B, n_tiles), _SUBLANE)


def _const_spec(shape, index_map):
    """BlockSpec for an operand whose block never changes: single-buffer it
    (default double-buffering of a constant block is pure VMEM waste)."""
    try:
        return pl.BlockSpec(shape, index_map, pipeline_mode=pl.Buffered(1))
    except (TypeError, AttributeError):
        return pl.BlockSpec(shape, index_map)


# ---------------------------------------------------------------------------
# Kernels
# ---------------------------------------------------------------------------

def _cate_kernel_resident(x_ref, w1_ref, b1_ref, w2_ref, b2_ref,
                          feat_ref, prob_ref):
    # bf16 cast of the streamed x tile happens here (free under DMA slack).
    x = x_ref[...].astype(jnp.bfloat16)

    # cf1 + ReLU: bf16 MXU operands, f32 accumulation, f32 bias/ReLU.
    h = jnp.dot(x, w1_ref[...], preferred_element_type=jnp.float32)
    h = jnp.maximum(h + b1_ref[...], 0.0)

    # cf2 -> x_feature.
    f = jnp.dot(h.astype(jnp.bfloat16), w2_ref[...],
                preferred_element_type=jnp.float32) + b2_ref[...]
    feat_ref[...] = f.astype(feat_ref.dtype)

    # Numerically stable softmax over the last axis (exact divide: the kernel
    # is HBM-bound, so the exact op is free and rows sum to 1 exactly).
    m = jnp.max(f, axis=-1, keepdims=True)
    e = jnp.exp(f - m)
    s = jnp.sum(e, axis=-1, keepdims=True)
    prob_ref[...] = (e / s).astype(prob_ref.dtype)


def _cate_kernel_htiled(x_ref, w1_ref, b1_ref, w2_ref, b2_ref,
                        feat_ref, prob_ref, acc_ref):
    # Hidden dim (2*e_model) is tiled over the trailing "arbitrary" grid axis.
    k = pl.program_id(1)

    @pl.when(k == 0)
    def _():
        acc_ref[...] = jnp.zeros_like(acc_ref)

    x = x_ref[...].astype(jnp.bfloat16)
    h = jnp.dot(x, w1_ref[...], preferred_element_type=jnp.float32)
    h = jnp.maximum(h + b1_ref[...], 0.0)
    acc_ref[...] += jnp.dot(h.astype(jnp.bfloat16), w2_ref[...],
                            preferred_element_type=jnp.float32)

    @pl.when(k == pl.num_programs(1) - 1)
    def _():
        f = acc_ref[...] + b2_ref[...]
        feat_ref[...] = f.astype(feat_ref.dtype)
        m = jnp.max(f, axis=-1, keepdims=True)
        e = jnp.exp(f - m)
        s = jnp.sum(e, axis=-1, keepdims=True)
        prob_ref[...] = (e / s).astype(prob_ref.dtype)


# ---------------------------------------------------------------------------
# VMEM sizing (used both for path selection and vmem_limit_bytes)
# ---------------------------------------------------------------------------

def _resident_vmem_bytes(E, H, S, TM, x_isz, o_isz):
    return (
        E * H * 2 + H * 4 + H * S * 2 + S * 4      # single-buffered weights/biases
        + 2 * TM * E * x_isz                       # x tile, double buffered
        + 2 * 2 * TM * S * o_isz                   # feat + probs, double buffered
        + TM * H * (4 + 2)                         # hidden activation (f32 + bf16 copy)
        + (2 << 20)                                # compiler scratch headroom
    )


def _htiled_vmem_bytes(E, H, S, TM, tH, x_isz, o_isz):
    return (
        2 * (E * tH * 2 + tH * 4 + tH * S * 2) + S * 4   # streamed W1/b1/W2 chunks + b2
        + 2 * TM * E * x_isz
        + 2 * 2 * TM * S * o_isz
        + TM * tH * (4 + 2)
        + TM * S * 4                                     # f32 accumulator scratch
        + (2 << 20)
    )


# ---------------------------------------------------------------------------
# Wrapper
# ---------------------------------------------------------------------------

def cate_forward(x, w1, b1, w2, b2, *, tm_max=512, hidden_tile=None,
                 out_dtype=jnp.float32):
    """Forward pass of Cate.

    x: (B, E); w1: (E, 2E); b1: (2E,); w2: (2E, S); b2: (S,).
    Weights are stored (in_features, out_features), i.e. already transposed
    relative to PyTorch's (out, in) layout.  Returns (x_feature, softmax),
    both (B, S) in `out_dtype` (bf16 halves output writeback if acceptable).
    """
    B, E = x.shape
    H = w1.shape[1]
    S = w2.shape[1]

    TM = _pick_tm(B, tm_max)
    Bp = _round_up(B, TM)

    # x streams in its native dtype (bf16 cast happens inside the kernel).
    # Only the batch dim is padded, and only when needed.
    x_p = x if Bp == B else jnp.pad(x, ((0, Bp - B), (0, 0)))

    # One-time dtype/layout conversions -- no-ops if params are already kept
    # as bf16 weights / f32 row biases across training/serving steps.
    w1_bf = w1.astype(jnp.bfloat16)
    w2_bf = w2.astype(jnp.bfloat16)
    b1_row = b1.reshape(1, H).astype(jnp.float32)
    b2_row = b2.reshape(1, S).astype(jnp.float32)

    out_shapes = (
        jax.ShapeDtypeStruct((Bp, S), out_dtype),   # x_feature
        jax.ShapeDtypeStruct((Bp, S), out_dtype),   # softmax
    )
    x_isz = x_p.dtype.itemsize
    o_isz = jnp.dtype(out_dtype).itemsize

    vmem_cap = _vmem_capacity_bytes()
    budget = int(0.8 * vmem_cap)
    resident_bytes = _resident_vmem_bytes(E, H, S, TM, x_isz, o_isz)

    # ---- path selection ----------------------------------------------------
    tH = None
    if hidden_tile is not None:
        tH = int(hidden_tile)
        if H % tH or tH % 128:
            raise ValueError(
                "hidden_tile must divide 2*e_model and be a multiple of 128")
    elif resident_bytes > budget and H % 128 == 0:
        for cand in range(H - 128, 0, -128):        # largest chunk that fits
            if H % cand == 0 and _htiled_vmem_bytes(
                    E, H, S, TM, cand, x_isz, o_isz) <= budget:
                tH = cand
                break
        # If nothing fits we fall back to the resident path below; shrinking
        # TM would be the next lever for truly huge models.

    if tH is None:
        # Weight-resident path: whole W1/W2 live in VMEM (single-buffered);
        # only x and the two outputs stream, batch axis is "parallel".
        vmem_limit = min(max(resident_bytes, 32 << 20), (vmem_cap * 15) // 16)
        grid_spec = pltpu.PrefetchScalarGridSpec(
            num_scalar_prefetch=0,
            grid=(Bp // TM,),
            in_specs=[
                pl.BlockSpec((TM, E), lambda i: (i, 0)),        # x: streamed
                _const_spec((E, H), lambda i: (0, 0)),          # w1: resident
                _const_spec((1, H), lambda i: (0, 0)),          # b1: resident
                _const_spec((H, S), lambda i: (0, 0)),          # w2: resident
                _const_spec((1, S), lambda i: (0, 0)),          # b2: resident
            ],
            out_specs=(
                pl.BlockSpec((TM, S), lambda i: (i, 0)),
                pl.BlockSpec((TM, S), lambda i: (i, 0)),
            ),
        )
        feat_p, probs_p = pl.pallas_call(
            _cate_kernel_resident,
            out_shape=out_shapes,
            grid_spec=grid_spec,
            compiler_params=pltpu.CompilerParams(
                dimension_semantics=("parallel",),
                vmem_limit_bytes=vmem_limit,
            ),
        )(x_p, w1_bf, b1_row, w2_bf, b2_row)
    else:
        # Large-model path: stream W1/W2 in hidden-dim chunks over a trailing
        # "arbitrary" reduction axis (needed first on v7x, 64 MiB VMEM).
        need = _htiled_vmem_bytes(E, H, S, TM, tH, x_isz, o_isz)
        vmem_limit = min(max(need, 32 << 20), (vmem_cap * 15) // 16)
        grid_spec = pltpu.PrefetchScalarGridSpec(
            num_scalar_prefetch=0,
            grid=(Bp // TM, H // tH),
            in_specs=[
                pl.BlockSpec((TM, E), lambda i, k: (i, 0)),     # x: constant over k
                pl.BlockSpec((E, tH), lambda i, k: (0, k)),     # w1 chunk
                pl.BlockSpec((1, tH), lambda i, k: (0, k)),     # b1 chunk
                pl.BlockSpec((tH, S), lambda i, k: (k, 0)),     # w2 chunk
                _const_spec((1, S), lambda i, k: (0, 0)),       # b2: resident
            ],
            out_specs=(
                pl.BlockSpec((TM, S), lambda i, k: (i, 0)),
                pl.BlockSpec((TM, S), lambda i, k: (i, 0)),
            ),
            scratch_shapes=[pltpu.VMEM((TM, S), jnp.float32)],
        )
        feat_p, probs_p = pl.pallas_call(
            _cate_kernel_htiled,
            out_shape=out_shapes,
            grid_spec=grid_spec,
            compiler_params=pltpu.CompilerParams(
                dimension_semantics=("parallel", "arbitrary"),
                vmem_limit_bytes=vmem_limit,
            ),
        )(x_p, w1_bf, b1_row, w2_bf, b2_row)

    if Bp != B:
        feat_p = feat_p[:B]
        probs_p = probs_p[:B]
    return feat_p, probs_p


def init_params(key, e_model, supercategories):
    """Deterministic init mimicking PyTorch nn.Linear default U(+-1/sqrt(fan_in)).
    Weights stored (in_features, out_features)."""
    k1, k2, k3, k4 = jax.random.split(key, 4)
    hidden = e_model * 2

    bound1 = 1.0 / jnp.sqrt(e_model)
    w1 = jax.random.uniform(k1, (e_model, hidden), jnp.float32, -bound1, bound1)
    b1 = jax.random.uniform(k2, (hidden,), jnp.float32, -bound1, bound1)

    bound2 = 1.0 / jnp.sqrt(hidden)
    w2 = jax.random.uniform(k3, (hidden, supercategories), jnp.float32, -bound2, bound2)
    b2 = jax.random.uniform(k4, (supercategories,), jnp.float32, -bound2, bound2)
    return w1, b1, w2, b2


if __name__ == "__main__":
    def reference(x, w1, b1, w2, b2):
        h = jnp.maximum(x @ w1 + b1, 0.0)
        feat = h @ w2 + b2
        return feat, jax.nn.softmax(feat, axis=-1)

    def check(feat, probs, feat_ref, probs_ref):
        # bf16 MXU operands vs f32 reference -> loose tolerances on values;
        # exact softmax divide -> rows sum to 1 to f32 precision.
        assert bool(jnp.allclose(feat, feat_ref, atol=5e-2, rtol=5e-2)), \
            float(jnp.max(jnp.abs(feat - feat_ref)))
        assert bool(jnp.allclose(probs, probs_ref, atol=2e-2, rtol=2e-2)), \
            float(jnp.max(jnp.abs(probs - probs_ref)))
        assert bool(jnp.allclose(jnp.sum(probs, axis=-1), 1.0, atol=1e-5))

    # ---- case 1: tiny shapes, weight-resident path -------------------------
    key = jax.random.PRNGKey(0)
    k_x, k_p = jax.random.split(key)
    batch, e_model, supercategories = 8, 32, 8

    x = jax.random.normal(k_x, (batch, e_model), jnp.float32)
    w1, b1, w2, b2 = init_params(k_p, e_model, supercategories)

    fwd = jax.jit(cate_forward)
    feat, probs = fwd(x, w1, b1, w2, b2)
    jax.block_until_ready((feat, probs))
    assert feat.shape == (batch, supercategories)
    assert probs.shape == (batch, supercategories)
    check(feat, probs, *reference(x, w1, b1, w2, b2))

    # ---- case 2: force the hidden-dim-reduction (large-model / v7x) path ---
    k_x2, k_p2 = jax.random.split(jax.random.PRNGKey(1))
    batch2, e_model2, supercategories2 = 48, 128, 10

    x2 = jax.random.normal(k_x2, (batch2, e_model2), jnp.float32)
    params2 = init_params(k_p2, e_model2, supercategories2)

    fwd_tiled = jax.jit(functools.partial(cate_forward, hidden_tile=128))
    feat2, probs2 = fwd_tiled(x2, *params2)
    jax.block_until_ready((feat2, probs2))
    assert feat2.shape == (batch2, supercategories2)
    check(feat2, probs2, *reference(x2, *params2))

    print("KERNEL_OK")
</pallas_src>

<mosaic_0001>
module attributes {stable_mosaic.version = 11 : i64} {
  func.func @_cate_kernel_resident(%arg0: i32, %arg1: memref<8x32xf32, #tpu.memory_space<vmem>>, %arg2: memref<32x64xbf16, #tpu.memory_space<vmem>>, %arg3: memref<1x64xf32, #tpu.memory_space<vmem>>, %arg4: memref<64x8xbf16, #tpu.memory_space<vmem>>, %arg5: memref<1x8xf32, #tpu.memory_space<vmem>>, %arg6: memref<8x8xf32, #tpu.memory_space<vmem>>, %arg7: memref<8x8xf32, #tpu.memory_space<vmem>>) attributes {dimension_semantics = [#tpu.dimension_semantics<parallel>], iteration_bounds = array<i64: 1>, scalar_prefetch = 0 : i64, scratch_operands = 0 : i64, tpu.core_type = #tpu.core_type<tc>, window_params = [{transform_indices = @transform_0, window_bounds = array<i64: 8, 32>}, {pipeline_mode = #tpu.pipeline_mode<synchronous>, transform_indices = @transform_1, window_bounds = array<i64: 32, 64>}, {pipeline_mode = #tpu.pipeline_mode<synchronous>, transform_indices = @transform_2, window_bounds = array<i64: 1, 64>}, {pipeline_mode = #tpu.pipeline_mode<synchronous>, transform_indices = @transform_3, window_bounds = array<i64: 64, 8>}, {pipeline_mode = #tpu.pipeline_mode<synchronous>, transform_indices = @transform_4, window_bounds = array<i64: 1, 8>}, {transform_indices = @transform_5, window_bounds = array<i64: 8, 8>}, {transform_indices = @transform_6, window_bounds = array<i64: 8, 8>}]} {
    %c0 = arith.constant 0 : index
    %c0_0 = arith.constant 0 : index
    %0 = vector.load %arg1[%c0, %c0_0] : memref<8x32xf32, #tpu.memory_space<vmem>>, vector<8x32xf32>
    %1 = arith.truncf %0 : vector<8x32xf32> to vector<8x32xbf16>
    %c0_1 = arith.constant 0 : index
    %c0_2 = arith.constant 0 : index
    %2 = vector.load %arg2[%c0_1, %c0_2] : memref<32x64xbf16, #tpu.memory_space<vmem>>, vector<32x64xbf16>
    %cst = arith.constant dense<0.000000e+00> : vector<8x64xf32>
    %3 = tpu.matmul %1, %2, %cst {dimension_numbers = #tpu.dot_dimension_numbers<[1], [0], [0], [1], [0, 0, 1, 1], [], []>} : vector<8x32xbf16>, vector<32x64xbf16>, vector<8x64xf32> -> vector<8x64xf32>
    %c0_3 = arith.constant 0 : index
    %c0_4 = arith.constant 0 : index
    %4 = vector.load %arg3[%c0_3, %c0_4] : memref<1x64xf32, #tpu.memory_space<vmem>>, vector<1x64xf32>
    %5 = vector.broadcast %4 : vector<1x64xf32> to vector<8x64xf32>
    %6 = arith.addf %3, %5 : vector<8x64xf32>
    %cst_5 = arith.constant 0.000000e+00 : f32
    %7 = vector.broadcast %cst_5 : f32 to vector<8x64xf32>
    %8 = arith.maximumf %6, %7 : vector<8x64xf32>
    %9 = arith.truncf %8 : vector<8x64xf32> to vector<8x64xbf16>
    %c0_6 = arith.constant 0 : index
    %c0_7 = arith.constant 0 : index
    %10 = vector.load %arg4[%c0_6, %c0_7] : memref<64x8xbf16, #tpu.memory_space<vmem>>, vector<64x8xbf16>
    %cst_8 = arith.constant dense<0.000000e+00> : vector<8x8xf32>
    %11 = tpu.matmul %9, %10, %cst_8 {dimension_numbers = #tpu.dot_dimension_numbers<[1], [0], [0], [1], [0, 0, 1, 1], [], []>} : vector<8x64xbf16>, vector<64x8xbf16>, vector<8x8xf32> -> vector<8x8xf32>
    %c0_9 = arith.constant 0 : index
    %c0_10 = arith.constant 0 : index
    %12 = vector.load %arg5[%c0_9, %c0_10] : memref<1x8xf32, #tpu.memory_space<vmem>>, vector<1x8xf32>
    %13 = vector.broadcast %12 : vector<1x8xf32> to vector<8x8xf32>
    %14 = arith.addf %11, %13 : vector<8x8xf32>
    %c0_11 = arith.constant 0 : index
    %c0_12 = arith.constant 0 : index
    %15 = vector.load %arg6[%c0_11, %c0_12] : memref<8x8xf32, #tpu.memory_space<vmem>>, vector<8x8xf32>
    tpu.vector_store %arg6[%c0_11, %c0_12], %14 {strides = array<i32>} : memref<8x8xf32, #tpu.memory_space<vmem>>, vector<8x8xf32>,
    %cst_13 = arith.constant dense<0xFF800000> : vector<8xf32>
    %16 = vector.multi_reduction <maximumf>, %14, %cst_13 [1] : vector<8x8xf32> to vector<8xf32>
    %17 = vector.shape_cast %16 : vector<8xf32> to vector<8x1xf32>
    %18 = vector.broadcast %17 : vector<8x1xf32> to vector<8x8xf32>
    %19 = arith.subf %14, %18 : vector<8x8xf32>
    %20 = math.exp %19 : vector<8x8xf32>
    %cst_14 = arith.constant dense<0.000000e+00> : vector<8xf32>
    %21 = vector.multi_reduction <add>, %20, %cst_14 [1] : vector<8x8xf32> to vector<8xf32>
    %22 = vector.shape_cast %21 : vector<8xf32> to vector<8x1xf32>
    %23 = vector.broadcast %22 : vector<8x1xf32> to vector<8x8xf32>
    %24 = arith.divf %20, %23 : vector<8x8xf32>
    %c0_15 = arith.constant 0 : index
    %c0_16 = arith.constant 0 : index
    %25 = vector.load %arg7[%c0_15, %c0_16] : memref<8x8xf32, #tpu.memory_space<vmem>>, vector<8x8xf32>
    tpu.vector_store %arg7[%c0_15, %c0_16], %24 {strides = array<i32>} : memref<8x8xf32, #tpu.memory_space<vmem>>, vector<8x8xf32>,
    return
  }
  func.func @transform_0(%arg0: i32) -> (i32, i32) {
    %c0_i32 = arith.constant 0 : i32
    %c0_i32_0 = arith.constant 0 : i32
    return %arg0, %c0_i32 : i32, i32
  }
  func.func @transform_1(%arg0: i32) -> (i32, i32) {
    %c0_i32 = arith.constant 0 : i32
    %c0_i32_0 = arith.constant 0 : i32
    %c0_i32_1 = arith.constant 0 : i32
    return %c0_i32, %c0_i32_0 : i32, i32
  }
  func.func @transform_2(%arg0: i32) -> (i32, i32) {
    %c0_i32 = arith.constant 0 : i32
    %c0_i32_0 = arith.constant 0 : i32
    %c0_i32_1 = arith.constant 0 : i32
    return %c0_i32, %c0_i32_0 : i32, i32
  }
  func.func @transform_3(%arg0: i32) -> (i32, i32) {
    %c0_i32 = arith.constant 0 : i32
    %c0_i32_0 = arith.constant 0 : i32
    %c0_i32_1 = arith.constant 0 : i32
    return %c0_i32, %c0_i32_0 : i32, i32
  }
  func.func @transform_4(%arg0: i32) -> (i32, i32) {
    %c0_i32 = arith.constant 0 : i32
    %c0_i32_0 = arith.constant 0 : i32
    %c0_i32_1 = arith.constant 0 : i32
    return %c0_i32, %c0_i32_0 : i32, i32
  }
  func.func @transform_5(%arg0: i32) -> (i32, i32) {
    %c0_i32 = arith.constant 0 : i32
    %c0_i32_0 = arith.constant 0 : i32
    return %arg0, %c0_i32 : i32, i32
  }
  func.func @transform_6(%arg0: i32) -> (i32, i32) {
    %c0_i32 = arith.constant 0 : i32
    %c0_i32_0 = arith.constant 0 : i32
    return %arg0, %c0_i32 : i32, i32
  }
}

</mosaic_0001>

<bundles_post_ra>
// kernel: cate_forward.1
= control target key start
LH: loop header
LB: loop body
LE: loop exit
PB: predicated region body
PF: predicated region fallthrough
CT: control target
= control target key end

     0   :  { %12 = vsyncpa [#allocation3], 0  ;;  %v321_v1 = vmov 0.0   ;;  %vm322_vm0 = vmmov 0   ;;  %vm50_vm1 = vcmask 261120   ;;  %s415_s0 = inlined_call_operand.vmem [shape: f32[8,32], index: 0, kind: input, shape index: {}]   ;;  %s416_s1 = inlined_call_operand.vmem [shape: bf16[32,64], index: 1, kind: input, shape index: {}]   ;;  %s417_s2 = inlined_call_operand.vmem [shape: f32[1,64], index: 2, kind: input, shape index: {}]   ;;  %s418_s3 = inlined_call_operand.vmem [shape: bf16[64,8], index: 3, kind: input, shape index: {}]   ;;  %s419_s4 = inlined_call_operand.vmem [shape: f32[1,8], index: 4, kind: input, shape index: {}]   ;;  %s420_s5 = inlined_call_operand.hbm [shape: f32[8,8], index: 5, kind: output, shape index: {0}]   ;;  %s421_s6 = inlined_call_operand.hbm [shape: f32[8,8], index: 6, kind: output, shape index: {1}]  }
   0x1   :  { %v263_v0 = vld [vmem:[%s416_s1] sm:$0xff]   ;;  %239 = vmatprep.subr.bf16.mxu0 %v321_v1  ;;  %v264_v2 = vld [vmem:[%s416_s1 + $0x8] sm:$0xff]   ;;  %247 = vmatprep.subr.bf16.mxu1 %v321_v1 }
   0x2   :  { %240 = vmatpush3.bf16.msra.mxu0 %v263_v0  ;;  %243 = vmatprep.mubr.msk.bf16.mxu0 %vm322_vm0, %v321_v1  ;;  %v25_v3 = vld [vmem:[%s415_s0] sm:$0xff]  ;;  %v266_v5 = vld [vmem:[%s418_s3 + $0x8] sm:$0xff]  }
   0x3   :  { %241 = vmatprep.subr.bf16.mxu0 %v321_v1  ;;  %v265_v4 = vld [vmem:[%s418_s3] sm:$0xff]   ;;  %255 = vmatprep.mubr.msk.bf16.mxu1 %vm322_vm0, %v321_v1  ;;  %v26_v6 = vpack.c.bf16 %v25_v3, %v25_v3 }
   0x4   :  { %248 = vmatpush3.bf16.msra.mxu1 %v265_v4 }
   0x5   :  { %249 = vmatprep.subr.bf16.mxu1 %v321_v1 }
   0x6   :  { %242 = vmatpush3.bf16.msra.mxu0 %v264_v2 }
   0x7   :  { %13 = vsyncpa [#allocation5], 0  ;;  %v267_v7 = vld [vmem:[%s418_s3 + $0x10] sm:$0xff]   ;;  %v268_v8 = vld [vmem:[%s418_s3 + $0x18] sm:$0xff]   ;;  %vm135_vm2 = vcmask 523264   ;;  %vm179_vm3 = vcmask 64512  }
   0x8   :  { %250 = vmatpush3.bf16.msra.mxu1 %v266_v5  ;;  %v221_v9 = vld [vmem:[%s417_s2] ss:$0 sm:$0xff]  ;;  %s323_s2 = smov [#allocation2]  }
   0x9   :  { %244 = vmatmul.mubr.msk.bf16.vlgmr.msra.gmra.mrb[0].mxu0 %vm50_vm1, %v26_v6  ;;  %251 = vmatprep.subr.bf16.mxu1 %v321_v1  ;;  %v225_v17 = vld [vmem:[%s419_s4] ss:$0 sm:$0xff]  ;;  %s199_s3 = sshll.u32 %s323_s2, 4  ;;  %s200_s3 = int_to_ptr.vmem [resolvable:$true] %s199_s3 }
   0xa   :  { %s273_s4 = scalar_lea.vmem %s200_s3, 128  ;;  %p278_p1 = scmp.lt.s32.totalorder %s200_s3, %s200_s3 }
   0xb   :  { %p274_p0 = scmp.ne.s32.totalorder %s200_s3, %s273_s4  ;;  %p279_p2 = scmp.lt.s32.totalorder %s273_s4, %s273_s4 }
   0xc   :  { %252 = vmatpush3.bf16.msra.mxu1 %v267_v7 }
   0xd   :  { %253 = vmatprep.subr.bf16.mxu1 %v321_v1  ;;  %p280_p3 = por %p279_p2, %p278_p1 }
   0xf   :  { %p281_p4 = pnand %p280_p3, %p274_p0 }
  0x10   :  { %254 = vmatpush3.bf16.msra.mxu1 %v268_v8 }
  0xdc   :  { %v88_v10 = vpop.f32.mrb[0].mxu0 }
  0xdd   :  { %v89_v11 = vadd.f32 %v221_v9, %v88_v10  ;;  %v245_v12 = vpop.f32.mrb[1].mxu0 }
  0xde   :  { %v91_v13 = vpop.f32.mrb[2].mxu0 }
  0xdf   :  { %v94_v14 = vmax.f32 %v89_v11, 0.0  ;;  %v246_v15 = vpop.f32.mrb[3].mxu0 }
  0xe1   :  { %v95_v16 = vpack.c.bf16 %v94_v14, %v94_v14 }
  0xe3   :  { %256 = vmatmul.mubr.msk.bf16.vlgmr.msra.gmra.mrb[0].mxu1 %vm135_vm2, %v95_v16 }
 0x1b6   :  { %v173_v18 = vpop.f32.mrb[0].mxu1 }
 0x1b7   :  { %v174_v19 = vadd.f32 %v225_v17, %v173_v18  ;;  %v257_v20 = vpop.f32.mrb[1].mxu1 }
 0x1b8   :  { %v176_v21 = vpop.f32.mrb[2].mxu1 }
 0x1b9   :  { %v258_v22 = vpop.f32.mrb[3].mxu1  ;;  %v181_v23 = vsel %vm179_vm3, %v174_v19, -inf  ;;  %180 = vst.msk [vmem:[#allocation2] sm:$0xff] %vm179_vm3, %v174_v19 }
 0x1ba   :  { %182 = vmax.xlane.f32.xlu0 %v181_v23 }
 0x247   :  { %v183_v24 = vpop.xlane.xlu0 %182 }
 0x248   :  { %v184_v25 = vsub.f32 %v174_v19, %v183_v24 }
 0x24a   :  { %v185_v26 = vmul.f32 1.442695, %v184_v25 }
 0x24c   :  { %269 = vpow2.f32 %v185_v26 }
 0x256   :  { %v270_v27 = vpop.eup %269 }
 0x257   :  { %v187_v28 = vsel %vm179_vm3, %v270_v27, 0.0 }
 0x258   :  { %188 = vadd.xlane.f32.xlu0 %v187_v28 }
 0x259   :  { %284 = shalt.err (!%p281_p4)
}
 0x25a   :  { %s285_s15 = scalar_lea.hbm %s420_s5, 128 }
 0x25b   :  { %p286_p5 = scmp.ne.s32.totalorder %s420_s5, %s285_s15  ;;  %p289_p6 = scmp.lt.u32.totalorder %s285_s15, %s420_s5 }
 0x25d   :  { %p291_p7 = pnand %p289_p6, %p286_p5 }
 0x25f   :  { %294 = shalt.err (!%p291_p7)
}
 0x260   :  { %202 = dma.vmem_to_hbm [thread:$0]  %s200_s3, 128, %s420_s5, [#allocation3]  }
 0x261   :  { %s324_s22 = smov [#allocation4]  }
 0x262   :  { %s209_s23 = sshll.u32 %s324_s22, 4  ;;  %s210_s23 = int_to_ptr.vmem [resolvable:$true] %s209_s23 }
 0x263   :  { %s295_s24 = scalar_lea.vmem %s210_s23, 128  ;;  %p300_p9 = scmp.lt.s32.totalorder %s210_s23, %s210_s23 }
 0x264   :  { %p296_p8 = scmp.ne.s32.totalorder %s210_s23, %s295_s24  ;;  %p301_p10 = scmp.lt.s32.totalorder %s295_s24, %s295_s24 }
 0x266   :  { %p302_p11 = por %p301_p10, %p300_p9 }
 0x268   :  { %p303_p12 = pnand %p302_p11, %p296_p8 }
 0x2e5   :  { %v189_v29 = vpop.xlane.xlu0 %188 }
 0x2e6   :  { %271 = vrcp.f32 %v189_v29 }
 0x2f0   :  { %v272_v30 = vpop.eup %271 }
 0x2f1   :  { %v191_v31 = vmul.f32 %v272_v30, %v270_v27 }
 0x2f3   :  { %192 = vst.msk [vmem:[#allocation4] sm:$0xff] %vm179_vm3, %v191_v31 }
 0x2f4   :  { %306 = shalt.err (!%p303_p12)
}
 0x2f5   :  { %s307_s5 = scalar_lea.hbm %s421_s6, 128 }
 0x2f6   :  { %p308_p13 = scmp.ne.s32.totalorder %s421_s6, %s307_s5  ;;  %p311_p0 = scmp.lt.u32.totalorder %s307_s5, %s421_s6 }
 0x2f8   :  { %p313_p1 = pnand %p311_p0, %p308_p13 }
 0x2fa   :  { %316 = shalt.err (!%p313_p1)
}
 0x2fb   :  { %212 = dma.vmem_to_hbm [thread:$0]  %s210_s23, 128, %s421_s6, [#allocation5]  }
 0x2fc   :  { %317 = dma.done.wait [#allocation3], 128  }
 0x2fd   :  { %318 = vsyncadd [#allocation3], 4294967168 }
 0x2fe   :  { %319 = dma.done.wait [#allocation5], 128  }
 0x2ff   :  { %320 = vsyncadd [#allocation5], 4294967168 }
 0x300   :  { %219 = vsyncpa [#allocation3], 1 }
 0x301   :  { %220 = vsyncpa [#allocation5], 1 }

</bundles_post_ra>
